<compile_context>
chip_gen: v6e
topology: v6e:2x2x1
jax: 0.10.0
libtpu: 0.0.40
codegen_flags: <defaults>
</compile_context>

<pallas_src>
import functools
import math

import jax
import jax.numpy as jnp
from jax import lax
from jax.experimental import pallas as pl
from jax.experimental.pallas import tpu as pltpu

EPS = 1e-5                      # ScaleNorm clamp epsilon
_VMEM_LIMIT = 64 * 1024 * 1024  # explicit scoped-VMEM budget (safe on v5e/v6e/v7x)


# ---------------------------------------------------------------------------
# Small helpers
# ---------------------------------------------------------------------------

def _row_tile(n: int, cap: int = 512) -> int:
    """Row-tile size: full array if rows aren't 8-aligned, else min(cap, n)."""
    if n % 8 != 0:
        return n
    return min(cap, n)


def _q_tile(tq: int) -> int:
    """Query tile for attention (prefer 256-wide MXU-friendly tiles)."""
    for t in (256, 128):
        if tq % t == 0:
            return t
    return tq


def _wspec(shape):
    """Constant-index (VMEM-resident) weight/bias block; single-buffered if supported."""
    idx = lambda *_: (0,) * len(shape)
    try:
        return pl.BlockSpec(shape, idx, pipeline_mode=pl.Buffered(1))
    except (TypeError, AttributeError):
        # Older JAX without pipeline_mode: fall back to the default (double-buffered).
        return pl.BlockSpec(shape, idx)


def _cparams(n_grid_dims: int):
    return pltpu.CompilerParams(
        dimension_semantics=("parallel",) * n_grid_dims,
        vmem_limit_bytes=_VMEM_LIMIT,
    )


def _scalenorm_rows(x, g):
    """ScaleNorm: x * g / max(||x||_2, eps) along the embed axis, f32 math."""
    norm = jnp.sqrt(jnp.sum(x * x, axis=-1, keepdims=True))
    inv = pl.reciprocal(jnp.maximum(norm, EPS), approx=True)
    return x * (g * inv)


# ---------------------------------------------------------------------------
# Kernels
# ---------------------------------------------------------------------------

def _scalenorm_kernel(x_ref, g_ref, o_ref):
    o_ref[...] = _scalenorm_rows(x_ref[...], g_ref[0, 0]).astype(o_ref.dtype)


def scalenorm(x2d, g):
    N, D = x2d.shape
    TM = _row_tile(N, cap=1024)
    return pl.pallas_call(
        _scalenorm_kernel,
        out_shape=jax.ShapeDtypeStruct((N, D), jnp.float32),
        grid=(pl.cdiv(N, TM),),
        in_specs=[
            pl.BlockSpec((TM, D), lambda i: (i, 0)),
            pl.BlockSpec(memory_space=pltpu.MemorySpace.SMEM),
        ],
        out_specs=pl.BlockSpec((TM, D), lambda i: (i, 0)),
        compiler_params=_cparams(1),
    )(x2d, g)


def _norm_qkv_kernel(x_ref, g_ref, w_ref, b_ref, oq_ref, okv_ref):
    """Fused ScaleNorm + concatenated QKV projection; split outputs q / kv (bf16)."""
    xn = _scalenorm_rows(x_ref[...], g_ref[0, 0])
    y = (jnp.dot(xn.astype(jnp.bfloat16), w_ref[...],
                 preferred_element_type=jnp.float32) + b_ref[...])
    D = oq_ref.shape[1]
    oq_ref[...] = y[:, :D].astype(oq_ref.dtype)
    okv_ref[...] = y[:, D:].astype(okv_ref.dtype)


def norm_qkv(x2d, g, wqkv, bqkv):
    N, D = x2d.shape
    F3 = wqkv.shape[1]          # 3*D
    TM = _row_tile(N)
    return pl.pallas_call(
        _norm_qkv_kernel,
        out_shape=(jax.ShapeDtypeStruct((N, D), jnp.bfloat16),
                   jax.ShapeDtypeStruct((N, F3 - D), jnp.bfloat16)),
        grid=(pl.cdiv(N, TM),),
        in_specs=[
            pl.BlockSpec((TM, D), lambda i: (i, 0)),
            pl.BlockSpec(memory_space=pltpu.MemorySpace.SMEM),
            _wspec((D, F3)),
            _wspec((1, F3)),
        ],
        out_specs=(pl.BlockSpec((TM, D), lambda i: (i, 0)),
                   pl.BlockSpec((TM, F3 - D), lambda i: (i, 0))),
        compiler_params=_cparams(1),
    )(x2d, g, wqkv, bqkv)


def _norm_matmul_kernel(x_ref, g_ref, w_ref, b_ref, o_ref):
    xn = _scalenorm_rows(x_ref[...], g_ref[0, 0])
    y = (jnp.dot(xn.astype(jnp.bfloat16), w_ref[...],
                 preferred_element_type=jnp.float32) + b_ref[...])
    o_ref[...] = y.astype(o_ref.dtype)


def norm_matmul(x2d, g, w, b):
    N, D = x2d.shape
    F = w.shape[1]
    TM = _row_tile(N)
    return pl.pallas_call(
        _norm_matmul_kernel,
        out_shape=jax.ShapeDtypeStruct((N, F), jnp.bfloat16),
        grid=(pl.cdiv(N, TM),),
        in_specs=[
            pl.BlockSpec((TM, D), lambda i: (i, 0)),
            pl.BlockSpec(memory_space=pltpu.MemorySpace.SMEM),
            _wspec((D, F)),
            _wspec((1, F)),
        ],
        out_specs=pl.BlockSpec((TM, F), lambda i: (i, 0)),
        compiler_params=_cparams(1),
    )(x2d, g, w, b)


def _matmul_bias_kernel(x_ref, w_ref, b_ref, o_ref):
    y = (jnp.dot(x_ref[...].astype(jnp.bfloat16), w_ref[...],
                 preferred_element_type=jnp.float32) + b_ref[...])
    o_ref[...] = y.astype(o_ref.dtype)


def matmul_bias(x2d, w, b):
    N, D = x2d.shape
    F = w.shape[1]
    TM = _row_tile(N)
    return pl.pallas_call(
        _matmul_bias_kernel,
        out_shape=jax.ShapeDtypeStruct((N, F), jnp.bfloat16),
        grid=(pl.cdiv(N, TM),),
        in_specs=[
            pl.BlockSpec((TM, D), lambda i: (i, 0)),
            _wspec((D, F)),
            _wspec((1, F)),
        ],
        out_specs=pl.BlockSpec((TM, F), lambda i: (i, 0)),
        compiler_params=_cparams(1),
    )(x2d, w, b)


def _attn_kernel(q_ref, kv_ref, m_ref, wo_ref, bo_ref, r_ref, o_ref, *, num_heads):
    """Fused MHA (softmax(qk^T + mask) v) + output projection + residual add.

    One (batch, Tq-tile) grid step processes ALL heads.  q already carries the
    1/sqrt(dk) scale (folded into the q projection weights).  The output is
    written lane-dense as [1, TQ, D].
    """
    H = num_heads
    D = q_ref.shape[2]
    dk = D // H
    q = q_ref[0]            # (TQ, D)  bf16
    kv = kv_ref[0]          # (Tk, 2D) bf16
    mask = m_ref[0]         # (TQ, Tk) f32 additive mask

    head_outs = []
    for h in range(H):      # static unroll; each head's scores die before the next
        q_h = q[:, h * dk:(h + 1) * dk]
        k_h = kv[:, h * dk:(h + 1) * dk]
        v_h = kv[:, D + h * dk:D + (h + 1) * dk]
        s = lax.dot_general(q_h, k_h, (((1,), (1,)), ((), ())),
                            preferred_element_type=jnp.float32)   # (TQ, Tk)
        s = s + mask
        s = s - jnp.max(s, axis=-1, keepdims=True)
        p = jnp.exp(s)
        p = p * pl.reciprocal(jnp.sum(p, axis=-1, keepdims=True), approx=True)
        head_outs.append(
            jnp.dot(p.astype(jnp.bfloat16), v_h, preferred_element_type=jnp.float32))

    attn = jnp.concatenate(head_outs, axis=-1)                    # (TQ, D) f32
    o_ref[0] = (r_ref[0]
                + jnp.dot(attn.astype(jnp.bfloat16), wo_ref[...],
                          preferred_element_type=jnp.float32)
                + bo_ref[...])


def attention(q3, kv3, mask_add, wo, bo, resid3, num_heads):
    """q3: [B, Tq, D] bf16, kv3: [B, Tk, 2D] bf16, mask_add: [1 or B, Tq, Tk] f32,
    resid3: [B, Tq, D] f32.  Returns resid + softmax(qk^T+mask) v @ wo + bo (f32)."""
    B, Tq, D = q3.shape
    Tk = kv3.shape[1]
    Mb = mask_add.shape[0]
    TQ = _q_tile(Tq)
    nq = Tq // TQ
    mask_idx = (lambda b, qi: (0, qi, 0)) if Mb == 1 else (lambda b, qi: (b, qi, 0))
    kernel = functools.partial(_attn_kernel, num_heads=num_heads)
    return pl.pallas_call(
        kernel,
        out_shape=jax.ShapeDtypeStruct((B, Tq, D), jnp.float32),
        grid=(B, nq),
        in_specs=[
            pl.BlockSpec((1, TQ, D), lambda b, qi: (b, qi, 0)),
            pl.BlockSpec((1, Tk, 2 * D), lambda b, qi: (b, 0, 0)),
            pl.BlockSpec((1, TQ, Tk), mask_idx),
            _wspec((D, D)),
            _wspec((1, D)),
            pl.BlockSpec((1, TQ, D), lambda b, qi: (b, qi, 0)),
        ],
        out_specs=pl.BlockSpec((1, TQ, D), lambda b, qi: (b, qi, 0)),
        compiler_params=_cparams(2),
    )(q3, kv3, mask_add, wo, bo, resid3)


def _norm_ffn_residual_kernel(x_ref, g_ref, w1_ref, b1_ref, w2_ref, b2_ref, r_ref,
                              o_ref, *, ff_chunks):
    """Fused: r + relu(ScaleNorm(x) @ W1 + b1) @ W2 + b2, FF chunked to bound the
    live hidden to [TM, FF/ff_chunks]."""
    xn = _scalenorm_rows(x_ref[...], g_ref[0, 0]).astype(jnp.bfloat16)
    FF = w1_ref.shape[1]
    C = FF // ff_chunks
    acc = r_ref[...] + b2_ref[...]                                 # (TM, D) f32
    for c in range(ff_chunks):
        h = (jnp.dot(xn, w1_ref[:, c * C:(c + 1) * C],
                     preferred_element_type=jnp.float32)
             + b1_ref[:, c * C:(c + 1) * C])
        h = jnp.maximum(h, 0.0).astype(jnp.bfloat16)               # (TM, C)
        acc = acc + jnp.dot(h, w2_ref[c * C:(c + 1) * C, :],
                            preferred_element_type=jnp.float32)
    o_ref[...] = acc


def norm_ffn_residual(x2d, g, w1, b1, w2, b2, r2d):
    N, D = x2d.shape
    FF = w1.shape[1]
    TM = _row_tile(N)
    chunk = 512
    ff_chunks = FF // chunk if (FF % chunk == 0 and FF > chunk) else 1
    kernel = functools.partial(_norm_ffn_residual_kernel, ff_chunks=ff_chunks)
    return pl.pallas_call(
        kernel,
        out_shape=jax.ShapeDtypeStruct((N, D), jnp.float32),
        grid=(pl.cdiv(N, TM),),
        in_specs=[
            pl.BlockSpec((TM, D), lambda i: (i, 0)),
            pl.BlockSpec(memory_space=pltpu.MemorySpace.SMEM),
            _wspec((D, FF)),
            _wspec((1, FF)),
            _wspec((FF, D)),
            _wspec((1, D)),
            pl.BlockSpec((TM, D), lambda i: (i, 0)),
        ],
        out_specs=pl.BlockSpec((TM, D), lambda i: (i, 0)),
        compiler_params=_cparams(1),
    )(x2d, g, w1, b1, w2, b2, r2d)


# ---------------------------------------------------------------------------
# Module forward (glue in plain JAX — no HBM transposes; hot paths in kernels)
# ---------------------------------------------------------------------------

def decoder_layer(p, src_encs, tgt_encs, src_mask_add, tgt_mask_add, num_heads):
    B, Tt, D = tgt_encs.shape
    Ts = src_encs.shape[1]
    Nt, Ns = B * Tt, B * Ts

    # --- sublayer 0: pre-norm self-attention (+ wo + residual fused) ------
    sa = p["self_attn"]
    q2d, kv2d = norm_qkv(tgt_encs.reshape(Nt, D), p["norm0"], sa["wqkv"], sa["bqkv"])
    tgt_encs = attention(q2d.reshape(B, Tt, D), kv2d.reshape(B, Tt, 2 * D),
                         tgt_mask_add, sa["wo"], sa["bo"], tgt_encs, num_heads)

    # --- sublayer 1: pre-norm cross-attention (k/v from raw src_encs) -----
    ca = p["crss_attn"]
    q2d = norm_matmul(tgt_encs.reshape(Nt, D), p["norm1"], ca["wq"], ca["bq"])
    kv2d = matmul_bias(src_encs.reshape(Ns, D), ca["wkv"], ca["bkv"])
    tgt_encs = attention(q2d.reshape(B, Tt, D), kv2d.reshape(B, Ts, 2 * D),
                         src_mask_add, ca["wo"], ca["bo"], tgt_encs, num_heads)

    # --- sublayer 2: pre-norm feed-forward + residual (fully fused) -------
    out = norm_ffn_residual(
        tgt_encs.reshape(Nt, D), p["norm2"],
        p["ff"]["w1"], p["ff"]["b1"], p["ff"]["w2"], p["ff"]["b2"],
        tgt_encs.reshape(Nt, D),
    )
    return out.reshape(B, Tt, D)


def decoder_forward(params, src_encs, tgt_embs, src_mask_add, tgt_mask_add, num_heads):
    tgt_encs = tgt_embs
    for lp in params["layers"]:
        tgt_encs = decoder_layer(
            lp, src_encs, tgt_encs, src_mask_add, tgt_mask_add, num_heads
        )
    B, Tt, D = tgt_encs.shape
    return scalenorm(tgt_encs.reshape(B * Tt, D),
                     params["final_norm"]).reshape(B, Tt, D)


# ---------------------------------------------------------------------------
# Deterministic parameter init (shapes implied by the PyTorch module).
# Weights stored bf16 (MXU fast path); biases / norm scales f32.
# The 1/sqrt(dk) attention scale is folded into the q projection (equivalent
# forward semantics, zero runtime cost).
# ---------------------------------------------------------------------------

def init_params(key, embed_dim, ff_dim, num_heads, num_layers):
    dk = embed_dim // num_heads
    scale = 1.0 / math.sqrt(dk)
    g0 = jnp.full((1, 1), embed_dim ** 0.5, jnp.float32)   # ScaleNorm learnable scale

    def mk_w(k, din, dout, s=1.0):
        return (jax.random.normal(k, (din, dout), jnp.float32) * 0.02 * s).astype(jnp.bfloat16)

    def mk_b(dout):
        return jnp.zeros((1, dout), jnp.float32)

    def self_attn_params(keys):
        wq = mk_w(keys[0], embed_dim, embed_dim, s=scale)   # scale folded into q
        wk = mk_w(keys[1], embed_dim, embed_dim)
        wv = mk_w(keys[2], embed_dim, embed_dim)
        return {
            "wqkv": jnp.concatenate([wq, wk, wv], axis=1),  # [D, 3D]
            "bqkv": mk_b(3 * embed_dim),                    # zeros (q-part scale moot)
            "wo": mk_w(keys[3], embed_dim, embed_dim),
            "bo": mk_b(embed_dim),
        }

    def cross_attn_params(keys):
        wk = mk_w(keys[1], embed_dim, embed_dim)
        wv = mk_w(keys[2], embed_dim, embed_dim)
        return {
            "wq": mk_w(keys[0], embed_dim, embed_dim, s=scale),  # scale folded into q
            "bq": mk_b(embed_dim),
            "wkv": jnp.concatenate([wk, wv], axis=1),            # [D, 2D]
            "bkv": mk_b(2 * embed_dim),
            "wo": mk_w(keys[3], embed_dim, embed_dim),
            "bo": mk_b(embed_dim),
        }

    layers = []
    for _ in range(num_layers):
        key, *ks = jax.random.split(key, 11)
        layers.append({
            "self_attn": self_attn_params(ks[0:4]),
            "crss_attn": cross_attn_params(ks[4:8]),
            "ff": {"w1": mk_w(ks[8], embed_dim, ff_dim), "b1": mk_b(ff_dim),
                   "w2": mk_w(ks[9], ff_dim, embed_dim), "b2": mk_b(embed_dim)},
            "norm0": g0, "norm1": g0, "norm2": g0,
        })
    return {"layers": layers, "final_norm": g0}


# ---------------------------------------------------------------------------
# Main
# ---------------------------------------------------------------------------

if __name__ == "__main__":
    B, T_SRC, T_TGT = 2, 8, 8
    EMBED, FF, HEADS, LAYERS = 32, 64, 4, 2

    key = jax.random.PRNGKey(0)
    k1, k2, k3 = jax.random.split(key, 3)
    src_encs = jax.random.normal(k1, (B, T_SRC, EMBED), jnp.float32)
    tgt_embs = jax.random.normal(k2, (B, T_TGT, EMBED), jnp.float32)
    params = init_params(k3, EMBED, FF, HEADS, LAYERS)

    # Additive masks (0 = keep, -1e9 = masked), matching masked_fill(mask==0, -inf).
    # Passed with a batch dim of 1: shared across B via the attention index_map
    # (no per-batch mask DMA); head broadcast happens inside the kernel.
    causal = jnp.tril(jnp.ones((T_TGT, T_TGT), jnp.float32))
    tgt_mask_add = jnp.where(causal == 0, -1e9, 0.0)[None]      # [1, Tt, Tt]
    src_mask_add = jnp.zeros((1, T_TGT, T_SRC), jnp.float32)    # no source masking

    out = decoder_forward(params, src_encs, tgt_embs, src_mask_add, tgt_mask_add, HEADS)
    out = jax.block_until_ready(out)
    assert out.shape == (B, T_TGT, EMBED)
    assert bool(jnp.all(jnp.isfinite(out)))
    print("KERNEL_OK")
</pallas_src>

<mosaic_0001>
module attributes {stable_mosaic.version = 11 : i64} {
  func.func @_norm_qkv_kernel(%arg0: i32, %arg1: memref<16x32xf32, #tpu.memory_space<vmem>>, %arg2: memref<1x1xf32, #tpu.memory_space<smem>>, %arg3: memref<32x96xbf16, #tpu.memory_space<vmem>>, %arg4: memref<1x96xf32, #tpu.memory_space<vmem>>, %arg5: memref<16x32xbf16, #tpu.memory_space<vmem>>, %arg6: memref<16x64xbf16, #tpu.memory_space<vmem>>) attributes {dimension_semantics = [#tpu.dimension_semantics<parallel>], iteration_bounds = array<i64: 1>, scalar_prefetch = 0 : i64, scratch_operands = 0 : i64, tpu.core_type = #tpu.core_type<tc>, window_params = [{transform_indices = @transform_0, window_bounds = array<i64: 16, 32>}, {transform_indices = @transform_1, window_bounds = array<i64: 1, 1>}, {pipeline_mode = #tpu.pipeline_mode<synchronous>, transform_indices = @transform_2, window_bounds = array<i64: 32, 96>}, {pipeline_mode = #tpu.pipeline_mode<synchronous>, transform_indices = @transform_3, window_bounds = array<i64: 1, 96>}, {transform_indices = @transform_4, window_bounds = array<i64: 16, 32>}, {transform_indices = @transform_5, window_bounds = array<i64: 16, 64>}]} {
    %c0 = arith.constant 0 : index
    %c0_0 = arith.constant 0 : index
    %0 = vector.load %arg1[%c0, %c0_0] : memref<16x32xf32, #tpu.memory_space<vmem>>, vector<16x32xf32>
    %c0_1 = arith.constant 0 : index
    %c0_2 = arith.constant 0 : index
    %1 = memref.load %arg2[%c0_1, %c0_2] : memref<1x1xf32, #tpu.memory_space<smem>>
    %2 = arith.mulf %0, %0 : vector<16x32xf32>
    %cst = arith.constant dense<0.000000e+00> : vector<16xf32>
    %3 = vector.multi_reduction <add>, %2, %cst [1] : vector<16x32xf32> to vector<16xf32>
    %4 = vector.shape_cast %3 : vector<16xf32> to vector<16x1xf32>
    %5 = math.sqrt %4 : vector<16x1xf32>
    %cst_3 = arith.constant 9.99999974E-6 : f32
    %6 = vector.broadcast %cst_3 : f32 to vector<16x1xf32>
    %7 = arith.maximumf %5, %6 : vector<16x1xf32>
    %8 = tpu.reciprocal %7 {approx = true} : vector<16x1xf32> -> vector<16x1xf32>
    %9 = vector.broadcast %1 : f32 to vector<16x1xf32>
    %10 = arith.mulf %9, %8 : vector<16x1xf32>
    %11 = vector.broadcast %10 : vector<16x1xf32> to vector<16x32xf32>
    %12 = arith.mulf %0, %11 : vector<16x32xf32>
    %13 = arith.truncf %12 : vector<16x32xf32> to vector<16x32xbf16>
    %c0_4 = arith.constant 0 : index
    %c0_5 = arith.constant 0 : index
    %14 = vector.load %arg3[%c0_4, %c0_5] : memref<32x96xbf16, #tpu.memory_space<vmem>>, vector<32x96xbf16>
    %cst_6 = arith.constant dense<0.000000e+00> : vector<16x96xf32>
    %15 = tpu.matmul %13, %14, %cst_6 {dimension_numbers = #tpu.dot_dimension_numbers<[1], [0], [0], [1], [0, 0, 1, 1], [], []>} : vector<16x32xbf16>, vector<32x96xbf16>, vector<16x96xf32> -> vector<16x96xf32>
    %c0_7 = arith.constant 0 : index
    %c0_8 = arith.constant 0 : index
    %16 = vector.load %arg4[%c0_7, %c0_8] : memref<1x96xf32, #tpu.memory_space<vmem>>, vector<1x96xf32>
    %17 = vector.broadcast %16 : vector<1x96xf32> to vector<16x96xf32>
    %18 = arith.addf %15, %17 : vector<16x96xf32>
    %19 = vector.extract_strided_slice %18 {offsets = [0, 0], sizes = [16, 32], strides = [1, 1]} : vector<16x96xf32> to vector<16x32xf32>
    %20 = arith.truncf %19 : vector<16x32xf32> to vector<16x32xbf16>
    %c0_9 = arith.constant 0 : index
    %c0_10 = arith.constant 0 : index
    %21 = vector.load %arg5[%c0_9, %c0_10] : memref<16x32xbf16, #tpu.memory_space<vmem>>, vector<16x32xbf16>
    tpu.vector_store %arg5[%c0_9, %c0_10], %20 {strides = array<i32>} : memref<16x32xbf16, #tpu.memory_space<vmem>>, vector<16x32xbf16>,
    %22 = vector.extract_strided_slice %18 {offsets = [0, 32], sizes = [16, 64], strides = [1, 1]} : vector<16x96xf32> to vector<16x64xf32>
    %23 = arith.truncf %22 : vector<16x64xf32> to vector<16x64xbf16>
    %c0_11 = arith.constant 0 : index
    %c0_12 = arith.constant 0 : index
    %24 = vector.load %arg6[%c0_11, %c0_12] : memref<16x64xbf16, #tpu.memory_space<vmem>>, vector<16x64xbf16>
    tpu.vector_store %arg6[%c0_11, %c0_12], %23 {strides = array<i32>} : memref<16x64xbf16, #tpu.memory_space<vmem>>, vector<16x64xbf16>,
    return
  }
  func.func @transform_0(%arg0: i32) -> (i32, i32) {
    %c0_i32 = arith.constant 0 : i32
    %c0_i32_0 = arith.constant 0 : i32
    return %arg0, %c0_i32 : i32, i32
  }
  func.func @transform_1(%arg0: i32) -> (i32, i32) {
    %c0_i32 = arith.constant 0 : i32
    %c0_i32_0 = arith.constant 0 : i32
    %c0_i32_1 = arith.constant 0 : i32
    return %c0_i32, %c0_i32_0 : i32, i32
  }
  func.func @transform_2(%arg0: i32) -> (i32, i32) {
    %c0_i32 = arith.constant 0 : i32
    %c0_i32_0 = arith.constant 0 : i32
    %c0_i32_1 = arith.constant 0 : i32
    return %c0_i32, %c0_i32_0 : i32, i32
  }
  func.func @transform_3(%arg0: i32) -> (i32, i32) {
    %c0_i32 = arith.constant 0 : i32
    %c0_i32_0 = arith.constant 0 : i32
    %c0_i32_1 = arith.constant 0 : i32
    return %c0_i32, %c0_i32_0 : i32, i32
  }
  func.func @transform_4(%arg0: i32) -> (i32, i32) {
    %c0_i32 = arith.constant 0 : i32
    %c0_i32_0 = arith.constant 0 : i32
    return %arg0, %c0_i32 : i32, i32
  }
  func.func @transform_5(%arg0: i32) -> (i32, i32) {
    %c0_i32 = arith.constant 0 : i32
    %c0_i32_0 = arith.constant 0 : i32
    return %arg0, %c0_i32 : i32, i32
  }
}

</mosaic_0001>

<bundles_post_ra>
// kernel: tpu_custom_call.1
= control target key start
LH: loop header
LB: loop body
LE: loop exit
PB: predicated region body
PF: predicated region fallthrough
CT: control target
= control target key end

     0   :  { %12 = vsyncpa [#allocation4], 0  ;;  %s407_s0 = inlined_call_operand.hbm [shape: f32[16,32], index: 0, kind: input, shape index: {}]   ;;  %s408_s1 = inlined_call_operand.<no memory space> [shape: f32[1,1], index: 1, kind: input, shape index: {}]   ;;  %s409_s2 = inlined_call_operand.hbm [shape: bf16[32,96], index: 2, kind: input, shape index: {}]   ;;  %s410_s3 = inlined_call_operand.vmem [shape: f32[1,96], index: 3, kind: input, shape index: {}]   ;;  %s411_s4 = inlined_call_operand.hbm [shape: bf16[16,32], index: 4, kind: output, shape index: {0}]   ;;  %s412_s5 = inlined_call_operand.hbm [shape: bf16[16,64], index: 5, kind: output, shape index: {1}]  }
   0x1   :  { %13 = vsyncpa [#allocation7], 0 }
   0x2   :  { %14 = vsyncpa [#allocation5], 0 }
   0x3   :  { %15 = vsyncpa [#allocation10], 0  ;;  %s336_s18 = smov [#allocation3]  }
   0x4   :  { %s21_s19 = sshll.u32 %s336_s18, 4  ;;  %s22_s19 = int_to_ptr.vmem [resolvable:$true] %s21_s19 }
   0x5   :  { %s256_s20 = scalar_lea.vmem %s22_s19, 256  ;;  %p261_p1 = scmp.lt.s32.totalorder %s22_s19, %s22_s19 }
   0x6   :  { %p257_p0 = scmp.ne.s32.totalorder %s22_s19, %s256_s20  ;;  %p262_p2 = scmp.lt.s32.totalorder %s256_s20, %s256_s20 }
   0x8   :  { %p263_p3 = por %p262_p2, %p261_p1 }
   0xa   :  { %p264_p4 = pnand %p263_p3, %p257_p0 }
   0xc   :  { %267 = shalt.err (!%p264_p4)
}
   0xd   :  { %s337_s21 = smov 128   ;;  %s338_s22 = smov 8  }
   0xe   :  { %27 = dma.hbm_to_vmem [thread:$0]  %s407_s0, 256, %s22_s19, [#allocation4], %s337_s21, %s337_s21, %s338_s22  }
   0xf   :  { %s339_s25 = smov [#allocation6]  }
  0x10   :  { %s35_s26 = sshll.u32 %s339_s25, 4  ;;  %s36_s26 = int_to_ptr.vmem [resolvable:$true] %s35_s26 }
  0x11   :  { %s276_s27 = scalar_lea.vmem %s36_s26, 256  ;;  %p281_p6 = scmp.lt.s32.totalorder %s36_s26, %s36_s26 }
  0x12   :  { %p277_p5 = scmp.ne.s32.totalorder %s36_s26, %s276_s27  ;;  %p282_p7 = scmp.lt.s32.totalorder %s276_s27, %s276_s27 }
  0x14   :  { %p283_p8 = por %p282_p7, %p281_p6 }
  0x16   :  { %p284_p9 = pnand %p283_p8, %p277_p5 }
  0x18   :  { %287 = shalt.err (!%p284_p9)
}
  0x19   :  { %s340_s28 = smov 64   ;;  %s341_s29 = smov 4  }
  0x1a   :  { %41 = dma.hbm_to_vmem [thread:$0]  %s409_s2, 256, %s36_s26, [#allocation7], %s340_s28, %s340_s28, %s341_s29  }
  0x1b   :  { %328 = dma.done.wait [#allocation4], 256  }
  0x1c   :  { %329 = vsyncadd [#allocation4], 4294967040 }
  0x1d   :  { %330 = dma.done.wait [#allocation7], 256  }
  0x1e   :  { %331 = vsyncadd [#allocation7], 4294967040  ;;  %v51_v0 = vld [vmem:[#allocation3] sm:$0xff]  ;;  %vm56_vm0 = vcmask 261120   ;;  %v52_v1 = vld [vmem:[#allocation3 + $0x8] sm:$0xff]  ;;  %v342_v7 = vmov 0.0   ;;  %v81_v24 = vstv %s408_s1 }
  0x1f   :  { %v54_v2 = vmul.f32 %v51_v0, %v51_v0  ;;  %v55_v3 = vmul.f32 %v52_v1, %v52_v1  ;;  %v238_v6 = vld [vmem:[#allocation6 + $0x8] sm:$0xff]   ;;  %219 = vmatprep.subr.bf16.mxu0 %v342_v7  ;;  %vm343_vm1 = vmmov 0   ;;  %v239_v8 = vld [vmem:[#allocation6] sm:$0xff]   ;;  %v208_v31 = vld [vmem:[%s410_s3] ss:$0 sm:$0xff]  ;;  %vm162_vm6 = vcmask 257024  }
  0x20   :  { %223 = vmatprep.mubr.msk.bf16.mxu0 %vm343_vm1, %v342_v7  ;;  %220 = vmatpush3.bf16.msra.mxu0 %v238_v6  ;;  %s344_s9 = smov [#allocation8]   ;;  %s345_s10 = smov 96  }
  0x21   :  { %v57_v4 = vsel %vm56_vm0, %v54_v2, 0.0  ;;  %v60_v5 = vsel %vm56_vm0, %v55_v3, 0.0  ;;  %221 = vmatprep.subr.bf16.mxu0 %v342_v7  ;;  %s179_s1 = sshll.u32 %s344_s9, 4  ;;  %s180_s1 = int_to_ptr.vmem [resolvable:$true] %s179_s1 }
  0x22   :  { %58 = vadd.xlane.f32.xlu0 %v57_v4  ;;  %s288_s11 = scalar_lea.vmem %s180_s1, 128  ;;  %p293_p11 = scmp.lt.s32.totalorder %s180_s1, %s180_s1 }
  0x23   :  { %p289_p10 = scmp.ne.s32.totalorder %s180_s1, %s288_s11  ;;  %p294_p12 = scmp.lt.s32.totalorder %s288_s11, %s288_s11 }
  0x24   :  { %222 = vmatpush3.bf16.msra.mxu0 %v239_v8 }
  0x25   :  { %p295_p13 = por %p294_p12, %p293_p11 }
  0x26   :  { %61 = vadd.xlane.f32.xlu0 %v60_v5 }
  0x27   :  { %p296_p0 = pnand %p295_p13, %p289_p10 }
  0xab   :  { %v59_v9 = vpop.xlane.xlu0 %58 }
  0xac   :  { %240 = vrsqrt.f32 %v59_v9  ;;  %vm65_vm2 = vcmp.eq.f32.partialorder %v59_v9, inf  ;;  %v68_v13 = vand.u32 2147483648, %v59_v9  ;;  %vm67_vm3 = vcmp.eq.f32.partialorder %v59_v9, 0.0 }
  0xaf   :  { %v62_v10 = vpop.xlane.xlu0 %61 }
  0xb0   :  { %242 = vrsqrt.f32 %v62_v10  ;;  %vm72_vm4 = vcmp.eq.f32.partialorder %v62_v10, inf  ;;  %v75_v19 = vand.u32 2147483648, %v62_v10  ;;  %vm74_vm5 = vcmp.eq.f32.partialorder %v62_v10, 0.0 }
  0xb9   :  { %v241_v11 = vpop.eup %240 }
  0xba   :  { %v64_v12 = vmul.f32 %v241_v11, %v59_v9 }
  0xbc   :  { %v66_v14 = vsel %vm65_vm2, %v59_v9, %v64_v12 }
  0xbd   :  { %v243_v15 = vpop.eup %242  ;;  %v69_v16 = vsel %vm67_vm3, %v68_v13, %v66_v14 }
  0xbe   :  { %v77_v17 = vmax.f32 %v69_v16, 1e-05  ;;  %v71_v18 = vmul.f32 %v243_v15, %v62_v10 }
  0xc0   :  { %244 = vrcp.f32 %v77_v17  ;;  %v73_v20 = vsel %vm72_vm4, %v62_v10, %v71_v18 }
  0xc1   :  { %v76_v21 = vsel %vm74_vm5, %v75_v19, %v73_v20 }
  0xc2   :  { %v78_v22 = vmax.f32 %v76_v21, 1e-05 }
  0xc4   :  { %246 = vrcp.f32 %v78_v22 }
  0xcd   :  { %v245_v23 = vpop.eup %244 }
  0xce   :  { %v82_v25 = vmul.f32 %v245_v23, %v81_v24 }
  0xd0   :  { %v84_v28 = vmul.f32 %v82_v25, %v51_v0 }
  0xd1   :  { %v247_v26 = vpop.eup %246 }
  0xd2   :  { %v83_v27 = vmul.f32 %v247_v26, %v81_v24 }
  0xd4   :  { %v85_v29 = vmul.f32 %v83_v27, %v52_v1 }
  0xd6   :  { %v86_v30 = vpack.c.bf16 %v85_v29, %v84_v28 }
  0xd8   :  { %224 = vmatmul.mubr.msk.bf16.vlgmr.msra.gmra.mxu0 %vm56_vm0, %v86_v30 }
 0x198   :  { %v147_v32 = vpop.f32.mrf.mxu0 }
 0x199   :  { %v148_v33 = vadd.f32 %v208_v31, %v147_v32 }
 0x19a   :  { %v225_v34 = vpop.f32.mrf.mxu0 }
 0x19b   :  { %v214_v35 = vpack.c.bf16 %v148_v33, %v148_v33 }
 0x19c   :  { %v150_v36 = vpop.f32.mrf.mxu0 }
 0x19d   :  { %v151_v37 = vadd.f32 %v208_v31, %v150_v36  ;;  %165 = vrot.lane.b32.xlu1 %v214_v35, %s345_s10  ;;  %163 = vst.msk [vmem:[#allocation8] sm:$0xf] %vm162_vm6, %v214_v35 }
 0x19e   :  { %v226_v38 = vpop.f32.mrf.mxu0 }
 0x19f   :  { %v215_v39 = vpack.c.bf16 %v151_v37, %v151_v37 }
 0x1a1   :  { %167 = vrot.lane.b32.xlu1 %v215_v39, %s345_s10  ;;  %164 = vst.msk [vmem:[#allocation8 + $0x4] sm:$0xf] %vm162_vm6, %v215_v39 }
 0x1a2   :  { %299 = shalt.err (!%p296_p0)
}
 0x1a3   :  { %185 = dma.vmem_to_hbm [thread:$0]  %s180_s1, 128, %s411_s4, [#allocation5], %s340_s28, %s340_s28, %s341_s29   ;;  %vm171_vm7 = vcmask 519168  }
 0x1a4   :  { %s346_s13 = smov [#allocation9]  }
 0x1a5   :  { %s191_s14 = sshll.u32 %s346_s13, 4  ;;  %s192_s14 = int_to_ptr.vmem [resolvable:$true] %s191_s14 }
 0x1a6   :  { %s308_s15 = scalar_lea.vmem %s192_s14, 128  ;;  %p313_p2 = scmp.lt.s32.totalorder %s192_s14, %s192_s14 }
 0x1a7   :  { %p309_p1 = scmp.ne.s32.totalorder %s192_s14, %s308_s15  ;;  %p314_p3 = scmp.lt.s32.totalorder %s308_s15, %s308_s15 }
 0x1a9   :  { %p315_p4 = por %p314_p3, %p313_p2 }
 0x1ab   :  { %p316_p5 = pnand %p315_p4, %p309_p1 }
 0x20f   :  { %v166_v40 = vpop.permute.xlu1 %165 }
 0x210   :  { %172 = vst.msk [vmem:[#allocation9] sm:$0xf] %vm171_vm7, %v166_v40 }
 0x213   :  { %v168_v41 = vpop.permute.xlu1 %167 }
 0x214   :  { %173 = vst.msk [vmem:[#allocation9 + $0x4] sm:$0xf] %vm171_vm7, %v168_v41 }
 0x215   :  { %319 = shalt.err (!%p316_p5)
}
 0x216   :  { %197 = dma.vmem_to_hbm [thread:$0]  %s192_s14, 128, %s412_s5, [#allocation10], %s340_s28, %s340_s28, %s341_s29  }
 0x217   :  { %332 = dma.done.wait [#allocation5], 128  }
 0x218   :  { %333 = vsyncadd [#allocation5], 4294967168 }
 0x219   :  { %334 = dma.done.wait [#allocation10], 128  }
 0x21a   :  { %335 = vsyncadd [#allocation10], 4294967168 }
 0x21b   :  { %204 = vsyncpa [#allocation4], 1 }
 0x21c   :  { %205 = vsyncpa [#allocation7], 1 }
 0x21d   :  { %206 = vsyncpa [#allocation5], 1 }
 0x21e   :  { %207 = vsyncpa [#allocation10], 1 }

</bundles_post_ra>
